<compile_context>
chip_gen: v7x
topology: tpu7x:2x2x1
jax: 0.10.0
libtpu: 0.0.40
codegen_flags: <defaults>
</compile_context>

<pallas_src>
import functools

import jax
import jax.numpy as jnp
from jax.experimental import pallas as pl
from jax.experimental.pallas import tpu as pltpu


def _iou_loss_kernel(pred_ref, tgt_ref, out_ref,
                     inter_acc, probs_acc, onehot_acc, *, eps):
    h = pl.program_id(1)

    @pl.when(h == 0)
    def _init():
        inter_acc[...] = jnp.zeros_like(inter_acc)
        probs_acc[...] = jnp.zeros_like(probs_acc)
        onehot_acc[...] = jnp.zeros_like(onehot_acc)

    # Upcast per tile; keeps narrow dtypes narrow on the HBM wire.
    p = pred_ref[0].astype(jnp.float32)            # (C, T)
    t = tgt_ref[0]                                 # (1, T) int32, -1 marks padding
    C, T = p.shape

    # Per-pixel softmax over the channel (sublane) axis: one reciprocal per pixel,
    # C multiplies, instead of C divides.
    m = jnp.max(p, axis=0, keepdims=True)          # (1, T)
    e = jnp.exp(p - m)                             # (C, T)
    inv = pl.reciprocal(jnp.sum(e, axis=0, keepdims=True))   # (1, T), exact
    probs = e * inv                                # (C, T)

    # Mask padded pixels (sentinel target < 0) so they contribute nothing to the sums.
    probs = jnp.where(t >= 0, probs, 0.0)

    # Implicit one-hot: channel iota vs. target index (no (C, T) f32 one-hot temp).
    ch = jax.lax.broadcasted_iota(jnp.int32, (C, T), 0)
    hit = ch == t                                  # (C, T) bool

    inter_acc[...] += jnp.sum(jnp.where(hit, probs, 0.0), axis=1, keepdims=True)
    probs_acc[...] += jnp.sum(probs, axis=1, keepdims=True)
    onehot_acc[...] += jnp.sum(hit.astype(jnp.float32), axis=1, keepdims=True)

    @pl.when(h == pl.num_programs(1) - 1)
    def _finalize():
        inter = inter_acc[...]                                 # (C, 1)
        union = probs_acc[...] + onehot_acc[...] - inter       # (C, 1)
        iou = (inter + eps) / (union + eps)                    # (C, 1)
        out_ref[0] = jnp.broadcast_to(iou, (C, 128))           # lane-dense write


def _round_up(x, m):
    return ((x + m - 1) // m) * m


def iou_loss(predictions, targets, eps=1e-6):
    """predictions: (N, C, H, W) float; targets: (N, H, W) integer class indices."""
    N, C, H, W = predictions.shape
    HW = H * W

    pred = predictions.reshape(N, C, HW)           # no host-side dtype cast pass
    tgt = targets.reshape(N, 1, HW)
    if tgt.dtype != jnp.int32:
        tgt = tgt.astype(jnp.int32)

    # Spatial tile: multiple of 128 lanes, sized so double-buffered prediction tiles
    # stay well under the default scoped-VMEM budget on v5e / v6e / v7x.
    itemsize = jnp.dtype(pred.dtype).itemsize
    budget = 8 * 1024 * 1024
    max_tile = max(128, (budget // (2 * C * itemsize)) // 128 * 128)
    num_h = max(1, pl.cdiv(HW, max_tile))
    tile_hw = _round_up(pl.cdiv(HW, num_h), 128)
    hw_pad = tile_hw * num_h

    if hw_pad != HW:
        pad = hw_pad - HW
        pred = jnp.pad(pred, ((0, 0), (0, 0), (0, pad)))
        tgt = jnp.pad(tgt, ((0, 0), (0, 0), (0, pad)), constant_values=-1)

    kernel = functools.partial(_iou_loss_kernel, eps=float(eps))

    iou_out = pl.pallas_call(
        kernel,
        out_shape=jax.ShapeDtypeStruct((N, C, 128), jnp.float32),
        grid_spec=pltpu.PrefetchScalarGridSpec(
            num_scalar_prefetch=0,
            grid=(N, num_h),
            in_specs=[
                pl.BlockSpec((1, C, tile_hw), lambda n, h: (n, 0, h)),
                pl.BlockSpec((1, 1, tile_hw), lambda n, h: (n, 0, h)),
            ],
            out_specs=pl.BlockSpec((1, C, 128), lambda n, h: (n, 0, 0)),
            scratch_shapes=[
                pltpu.VMEM((C, 1), jnp.float32),   # intersection partials
                pltpu.VMEM((C, 1), jnp.float32),   # sum(probs) partials
                pltpu.VMEM((C, 1), jnp.float32),   # one-hot count partials
            ],
        ),
        compiler_params=pltpu.CompilerParams(
            dimension_semantics=("parallel", "arbitrary")),
    )(pred, tgt)

    iou = iou_out[:, :, 0]                         # (N, C) per-image, per-class IoU
    return 1.0 - jnp.mean(iou)


def _iou_loss_ref(predictions, targets, eps=1e-6):
    probs = jax.nn.softmax(predictions.astype(jnp.float32), axis=1)
    onehot = jax.nn.one_hot(targets, predictions.shape[1], axis=1,
                            dtype=jnp.float32)
    inter = jnp.sum(probs * onehot, axis=(2, 3))
    union = jnp.sum(probs, axis=(2, 3)) + jnp.sum(onehot, axis=(2, 3)) - inter
    iou = (inter + eps) / (union + eps)
    return 1.0 - jnp.mean(iou)


if __name__ == "__main__":
    key = jax.random.PRNGKey(0)
    kp, kt = jax.random.split(key)
    N, C, H, W = 2, 4, 16, 16
    predictions = jax.random.normal(kp, (N, C, H, W), dtype=jnp.float32)
    targets = jax.random.randint(kt, (N, H, W), 0, C, dtype=jnp.int32)

    loss = jax.block_until_ready(iou_loss(predictions, targets))
    ref = jax.block_until_ready(_iou_loss_ref(predictions, targets))

    assert jnp.allclose(loss, ref, atol=1e-5, rtol=1e-5), (loss, ref)
    print("KERNEL_OK")
</pallas_src>

<mosaic_0001>
module attributes {stable_mosaic.version = 11 : i64} {
  func.func @_iou_loss_kernel(%arg0: i32, %arg1: i32, %arg2: memref<1x4x256xf32, #tpu.memory_space<vmem>>, %arg3: memref<1x1x256xi32, #tpu.memory_space<vmem>>, %arg4: memref<1x4x128xf32, #tpu.memory_space<vmem>>, %arg5: memref<4x1xf32, #tpu.memory_space<vmem>>, %arg6: memref<4x1xf32, #tpu.memory_space<vmem>>, %arg7: memref<4x1xf32, #tpu.memory_space<vmem>>) attributes {dimension_semantics = [#tpu.dimension_semantics<parallel>, #tpu.dimension_semantics<arbitrary>], iteration_bounds = array<i64: 2, 1>, scalar_prefetch = 0 : i64, scratch_operands = 3 : i64, tpu.core_type = #tpu.core_type<tc>, window_params = [{transform_indices = @transform_0, window_bounds = array<i64: 1, 4, 256>}, {transform_indices = @transform_1, window_bounds = array<i64: 1, 1, 256>}, {transform_indices = @transform_2, window_bounds = array<i64: 1, 4, 128>}]} {
    %c0_i32 = arith.constant 0 : i32
    %0 = arith.cmpi eq, %arg1, %c0_i32 : i32
    %1 = arith.extui %0 : i1 to i32
    %c0_i32_0 = arith.constant 0 : i32
    %2 = arith.cmpi ne, %1, %c0_i32_0 : i32
    scf.if %2 {
      %cst_27 = arith.constant 0.000000e+00 : f32
      %48 = vector.broadcast %cst_27 : f32 to vector<4x1xf32>
      %c0_28 = arith.constant 0 : index
      %c0_29 = arith.constant 0 : index
      %49 = vector.load %arg5[%c0_28, %c0_29] : memref<4x1xf32, #tpu.memory_space<vmem>>, vector<4x1xf32>
      tpu.vector_store %arg5[%c0_28, %c0_29], %48 {strides = array<i32>} : memref<4x1xf32, #tpu.memory_space<vmem>>, vector<4x1xf32>,
      %cst_30 = arith.constant 0.000000e+00 : f32
      %50 = vector.broadcast %cst_30 : f32 to vector<4x1xf32>
      %c0_31 = arith.constant 0 : index
      %c0_32 = arith.constant 0 : index
      %51 = vector.load %arg6[%c0_31, %c0_32] : memref<4x1xf32, #tpu.memory_space<vmem>>, vector<4x1xf32>
      tpu.vector_store %arg6[%c0_31, %c0_32], %50 {strides = array<i32>} : memref<4x1xf32, #tpu.memory_space<vmem>>, vector<4x1xf32>,
      %cst_33 = arith.constant 0.000000e+00 : f32
      %52 = vector.broadcast %cst_33 : f32 to vector<4x1xf32>
      %c0_34 = arith.constant 0 : index
      %c0_35 = arith.constant 0 : index
      %53 = vector.load %arg7[%c0_34, %c0_35] : memref<4x1xf32, #tpu.memory_space<vmem>>, vector<4x1xf32>
      tpu.vector_store %arg7[%c0_34, %c0_35], %52 {strides = array<i32>} : memref<4x1xf32, #tpu.memory_space<vmem>>, vector<4x1xf32>,
    } else {
    }
    %c0 = arith.constant 0 : index
    %c0_1 = arith.constant 0 : index
    %c0_2 = arith.constant 0 : index
    %3 = vector.load %arg2[%c0, %c0_1, %c0_2] : memref<1x4x256xf32, #tpu.memory_space<vmem>>, vector<1x4x256xf32>
    %4 = vector.shape_cast %3 : vector<1x4x256xf32> to vector<4x256xf32>
    %c0_3 = arith.constant 0 : index
    %c0_4 = arith.constant 0 : index
    %c0_5 = arith.constant 0 : index
    %5 = vector.load %arg3[%c0_3, %c0_4, %c0_5] : memref<1x1x256xi32, #tpu.memory_space<vmem>>, vector<1x1x256xi32>
    %6 = vector.shape_cast %5 : vector<1x1x256xi32> to vector<1x256xi32>
    %cst = arith.constant dense<0xFF800000> : vector<256xf32>
    %7 = vector.multi_reduction <maximumf>, %4, %cst [0] : vector<4x256xf32> to vector<256xf32>
    %8 = vector.shape_cast %7 : vector<256xf32> to vector<1x256xf32>
    %9 = vector.broadcast %8 : vector<1x256xf32> to vector<4x256xf32>
    %10 = arith.subf %4, %9 : vector<4x256xf32>
    %11 = math.exp %10 : vector<4x256xf32>
    %cst_6 = arith.constant dense<0.000000e+00> : vector<256xf32>
    %12 = vector.multi_reduction <add>, %11, %cst_6 [0] : vector<4x256xf32> to vector<256xf32>
    %13 = vector.shape_cast %12 : vector<256xf32> to vector<1x256xf32>
    %14 = tpu.reciprocal %13 : vector<1x256xf32> -> vector<1x256xf32>
    %15 = vector.broadcast %14 : vector<1x256xf32> to vector<4x256xf32>
    %16 = arith.mulf %11, %15 : vector<4x256xf32>
    %c0_i32_7 = arith.constant 0 : i32
    %17 = vector.broadcast %c0_i32_7 : i32 to vector<1x256xi32>
    %18 = arith.cmpi sge, %6, %17 : vector<1x256xi32>
    %cst_8 = arith.constant 0.000000e+00 : f32
    %19 = vector.shape_cast %18 : vector<1x256xi1> to vector<1x256xi1>
    %20 = vector.broadcast %19 : vector<1x256xi1> to vector<4x256xi1>
    %21 = vector.broadcast %cst_8 : f32 to vector<4x256xf32>
    %22 = arith.select %20, %16, %21 : vector<4x256xi1>, vector<4x256xf32>
    %23 = tpu.iota {dimensions = array<i32: 0>} : vector<4x256xi32>
    %24 = vector.broadcast %6 : vector<1x256xi32> to vector<4x256xi32>
    %25 = arith.cmpi eq, %23, %24 : vector<4x256xi32>
    %c0_9 = arith.constant 0 : index
    %c0_10 = arith.constant 0 : index
    %26 = vector.load %arg5[%c0_9, %c0_10] : memref<4x1xf32, #tpu.memory_space<vmem>>, vector<4x1xf32>
    %cst_11 = arith.constant 0.000000e+00 : f32
    %27 = vector.broadcast %cst_11 : f32 to vector<4x256xf32>
    %28 = arith.select %25, %22, %27 : vector<4x256xi1>, vector<4x256xf32>
    %cst_12 = arith.constant dense<0.000000e+00> : vector<4xf32>
    %29 = vector.multi_reduction <add>, %28, %cst_12 [1] : vector<4x256xf32> to vector<4xf32>
    %30 = vector.shape_cast %29 : vector<4xf32> to vector<4x1xf32>
    %31 = arith.addf %26, %30 : vector<4x1xf32>
    %c0_13 = arith.constant 0 : index
    %c0_14 = arith.constant 0 : index
    %32 = vector.load %arg5[%c0_13, %c0_14] : memref<4x1xf32, #tpu.memory_space<vmem>>, vector<4x1xf32>
    tpu.vector_store %arg5[%c0_13, %c0_14], %31 {strides = array<i32>} : memref<4x1xf32, #tpu.memory_space<vmem>>, vector<4x1xf32>,
    %c0_15 = arith.constant 0 : index
    %c0_16 = arith.constant 0 : index
    %33 = vector.load %arg6[%c0_15, %c0_16] : memref<4x1xf32, #tpu.memory_space<vmem>>, vector<4x1xf32>
    %cst_17 = arith.constant dense<0.000000e+00> : vector<4xf32>
    %34 = vector.multi_reduction <add>, %22, %cst_17 [1] : vector<4x256xf32> to vector<4xf32>
    %35 = vector.shape_cast %34 : vector<4xf32> to vector<4x1xf32>
    %36 = arith.addf %33, %35 : vector<4x1xf32>
    %c0_18 = arith.constant 0 : index
    %c0_19 = arith.constant 0 : index
    %37 = vector.load %arg6[%c0_18, %c0_19] : memref<4x1xf32, #tpu.memory_space<vmem>>, vector<4x1xf32>
    tpu.vector_store %arg6[%c0_18, %c0_19], %36 {strides = array<i32>} : memref<4x1xf32, #tpu.memory_space<vmem>>, vector<4x1xf32>,
    %c0_20 = arith.constant 0 : index
    %c0_21 = arith.constant 0 : index
    %38 = vector.load %arg7[%c0_20, %c0_21] : memref<4x1xf32, #tpu.memory_space<vmem>>, vector<4x1xf32>
    %39 = arith.extui %25 : vector<4x256xi1> to vector<4x256xi32>
    %40 = arith.sitofp %39 : vector<4x256xi32> to vector<4x256xf32>
    %cst_22 = arith.constant dense<0.000000e+00> : vector<4xf32>
    %41 = vector.multi_reduction <add>, %40, %cst_22 [1] : vector<4x256xf32> to vector<4xf32>
    %42 = vector.shape_cast %41 : vector<4xf32> to vector<4x1xf32>
    %43 = arith.addf %38, %42 : vector<4x1xf32>
    %c0_23 = arith.constant 0 : index
    %c0_24 = arith.constant 0 : index
    %44 = vector.load %arg7[%c0_23, %c0_24] : memref<4x1xf32, #tpu.memory_space<vmem>>, vector<4x1xf32>
    tpu.vector_store %arg7[%c0_23, %c0_24], %43 {strides = array<i32>} : memref<4x1xf32, #tpu.memory_space<vmem>>, vector<4x1xf32>,
    %c0_i32_25 = arith.constant 0 : i32
    %45 = arith.cmpi eq, %arg1, %c0_i32_25 : i32
    %46 = arith.extui %45 : i1 to i32
    %c0_i32_26 = arith.constant 0 : i32
    %47 = arith.cmpi ne, %46, %c0_i32_26 : i32
    scf.if %47 {
      %c0_27 = arith.constant 0 : index
      %c0_28 = arith.constant 0 : index
      %48 = vector.load %arg5[%c0_27, %c0_28] : memref<4x1xf32, #tpu.memory_space<vmem>>, vector<4x1xf32>
      %c0_29 = arith.constant 0 : index
      %c0_30 = arith.constant 0 : index
      %49 = vector.load %arg6[%c0_29, %c0_30] : memref<4x1xf32, #tpu.memory_space<vmem>>, vector<4x1xf32>
      %c0_31 = arith.constant 0 : index
      %c0_32 = arith.constant 0 : index
      %50 = vector.load %arg7[%c0_31, %c0_32] : memref<4x1xf32, #tpu.memory_space<vmem>>, vector<4x1xf32>
      %51 = arith.addf %49, %50 : vector<4x1xf32>
      %52 = arith.subf %51, %48 : vector<4x1xf32>
      %cst_33 = arith.constant 9.99999997E-7 : f32
      %53 = vector.broadcast %cst_33 : f32 to vector<4x1xf32>
      %54 = arith.addf %48, %53 : vector<4x1xf32>
      %cst_34 = arith.constant 9.99999997E-7 : f32
      %55 = vector.broadcast %cst_34 : f32 to vector<4x1xf32>
      %56 = arith.addf %52, %55 : vector<4x1xf32>
      %57 = arith.divf %54, %56 : vector<4x1xf32>
      %58 = vector.shape_cast %57 : vector<4x1xf32> to vector<4x1xf32>
      %59 = vector.broadcast %58 : vector<4x1xf32> to vector<4x128xf32>
      %c0_35 = arith.constant 0 : index
      %c0_36 = arith.constant 0 : index
      %c0_37 = arith.constant 0 : index
      %60 = vector.load %arg4[%c0_35, %c0_36, %c0_37] : memref<1x4x128xf32, #tpu.memory_space<vmem>>, vector<1x4x128xf32>
      %61 = vector.shape_cast %60 : vector<1x4x128xf32> to vector<4x128xf32>
      %62 = vector.shape_cast %59 : vector<4x128xf32> to vector<1x4x128xf32>
      tpu.vector_store %arg4[%c0_35, %c0_36, %c0_37], %62 {strides = array<i32>} : memref<1x4x128xf32, #tpu.memory_space<vmem>>, vector<1x4x128xf32>,
    } else {
    }
    return
  }
  func.func @transform_0(%arg0: i32, %arg1: i32) -> (i32, i32, i32) {
    %c0_i32 = arith.constant 0 : i32
    %c0_i32_0 = arith.constant 0 : i32
    return %arg0, %c0_i32, %arg1 : i32, i32, i32
  }
  func.func @transform_1(%arg0: i32, %arg1: i32) -> (i32, i32, i32) {
    %c0_i32 = arith.constant 0 : i32
    %c0_i32_0 = arith.constant 0 : i32
    return %arg0, %c0_i32, %arg1 : i32, i32, i32
  }
  func.func @transform_2(%arg0: i32, %arg1: i32) -> (i32, i32, i32) {
    %c0_i32 = arith.constant 0 : i32
    %c0_i32_0 = arith.constant 0 : i32
    %c0_i32_1 = arith.constant 0 : i32
    return %arg0, %c0_i32, %c0_i32_0 : i32, i32, i32
  }
}

</mosaic_0001>

<bundles_post_ra>
// kernel: tpu_custom_call.1
= control target key start
LH: loop header
LB: loop body
LE: loop exit
PB: predicated region body
PF: predicated region fallthrough
CT: control target
= control target key end

     0   :  { %7 = vsyncpa [#allocation6], 0  ;;  %s988_s0 = inlined_call_operand.hbm [shape: f32[2,4,256], index: 0, kind: input, shape index: {}]   ;;  %s989_s1 = inlined_call_operand.hbm [shape: s32[2,1,256], index: 1, kind: input, shape index: {}]   ;;  %s990_s2 = inlined_call_operand.hbm [shape: f32[2,4,128], index: 2, kind: output, shape index: {}]  }
   0x1   :  { %9 = vsyncpa [#allocation6 + $0x1], 0 }
   0x2   :  { %10 = vsyncpa [#allocation9], 0 }
   0x3   :  { %12 = vsyncpa [#allocation9 + $0x1], 0 }
   0x4   :  { %13 = vsyncpa [#allocation7], 0 }
   0x5   :  { %15 = vsyncpa [#allocation7 + $0x1], 0  ;;  %s748_s9 = smov 0   ;;  %s750_s10 = smov 0  }
   0x6   :  { %s752_s11 = smov 0   ;;  %s754_s12 = smov 0  }
   0x7   :  { %s756_s13 = smov 0   ;;  %s758_s14 = smov 0  }
   0x8 LB: > { %s478_s15 = sadd.s32 4294967295, %s726_s14   ;;  %s479_s16 = sadd.s32 4294967294, %s726_s14   ;;  %s726_s14 = sphi %s758_s14, %s21_s14   ;;  %s722_s13 = sphi %s756_s13, %s1010_s13   ;;  %s718_s12 = sphi %s754_s12, %s1009_s12   ;;  %s714_s11 = sphi %s752_s11, %s1008_s11   ;;  %s710_s10 = sphi %s750_s10, %s1007_s10   ;;  %s706_s9 = sphi %s748_s9, %s1006_s9  }
   0x9   : > { %s33_s17 = sadd.s32 1, %s722_s13  ;;  %s42_s18 = sadd.s32 1, %s714_s11 }
   0xa   : > { %p35_p0 = scmp.ge.s32.totalorder %s33_s17, 2  ;;  %p49_p1 = scmp.ne.s32.totalorder %s714_s11, %s710_s10 }
   0xb   : > { %p50_p2 = scmp.eq.s32.totalorder %s726_s14, 0  ;;  %p55_p3 = scmp.ne.s32.totalorder %s710_s10, %s706_s9 }
   0xc   : > { %s1012_s17 = smov (%p35_p0, %s33_s17), 0  ;;  %p56_p5 = scmp.eq.s32.totalorder %s478_s15, 0 }
   0xd   : > { %p789_p4 = por %p50_p2, %p49_p1  ;;  %s37_s20 = ssub.s32 %s722_s13, %s1012_s17 }
   0xe   : > { %p107_p6 = scmp.eq.s32.totalorder %s478_s15, 1  ;;  %p40_p7 = scmp.eq.s32.totalorder %s37_s20, 0 }
   0xf   : > { %p795_p8 = por %p56_p5, %p55_p3  ;;  %p113_p10 = scmp.eq.s32.totalorder %s479_s16, 1 }
  0x10   : > { %p799_p9 = por %p107_p6, %p49_p1  ;;  %p517_p13 = scmp.lt.s32.totalorder %s726_s14, 2 }
  0x11   : > { %s994_s21 = scalar_select %p795_p8, 1, 0 }
  0x12   : > { %s995_s22 = scalar_select %p799_p9, 1, 0 }
  0x13   : > { %s804_s23 = scalar_select %p40_p7, %s714_s11, %s42_s18  }
  0x14   : > { %p806_p11 = por %p113_p10, %p55_p3  ;;  %s813_s25 = sand.u32 1, %s714_s11  }
  0x15   : > { %s482_s26 = sshll.u32 %s813_s25, 3  ;;  %s498_s27 = sshll.u32 %s722_s13, 7 }
  0x16   : > { %s996_s24 = scalar_select %p806_p11, 1, 0 }
  0x17   : > { %s820_s30 = scalar_lea.hbm %s988_s0, %s498_s27  ;;  %s137_s3 = scalar_lea.vmem [#allocation5], %s482_s26 }
  0x18   : > { %s147_s4 = sshll.u32 %s137_s3, 4  ;;  %p826_p0 = pnand %p517_p13, %p789_p4  ;;  %s822_s4 = int_to_ptr.vmem [resolvable:$true] %s147_s4 }
  0x19   : > { %s134_s6 = scalar_lea.sflag [#allocation6], %s813_s25  ;;  %s580_s7 = scalar_lea.hbm %s820_s30, 128 }
  0x1a   : > { %p581_p3 = scmp.ne.s32.totalorder %s820_s30, %s580_s7  ;;  %p582_p5 = pneg %p826_p0 }
  0x1b   : > { %s585_s16 = scalar_lea.hbm %s988_s0, 256  ;;  %p586_p4 = scmp.lt.u32.totalorder %s820_s30, %s988_s0 }
  0x1c   : > { %p583_p6 = pnand %p582_p5, %p581_p3  ;;  %p587_p10 = scmp.lt.u32.totalorder %s585_s16, %s580_s7 }
  0x1d   : > { %p589_p12 = scmp.lt.u32.totalorder %s580_s7, %s820_s30 }
  0x1e   : > { %p584_p7 = pneg %p583_p6  ;;  %p588_p13 = por %p587_p10, %p586_p4 }
  0x20   : > { %p590_p1 = por %p589_p12, %p588_p13 }
  0x22   : > { %p591_p2 = pnand %p590_p1, %p584_p7 }
  0x24   : > { %594 = shalt.err (!%p591_p2)
}
  0x25   : > { %s595_s20 = scalar_lea.vmem %s822_s4, 128  ;;  %s728_s26 = smov [#allocation5]  }
  0x26   : > { %p596_p3 = scmp.ne.s32.totalorder %s822_s4, %s595_s20  ;;  %s600_s27 = sshll.u32 %s728_s26, 4  ;;  %s601_s27 = int_to_ptr.vmem [resolvable:$false] %s600_s27 }
  0x27   : > { %s602_s28 = scalar_lea.vmem %s601_s27, 256  ;;  %p603_p9 = scmp.lt.s32.totalorder %s822_s4, %s601_s27 }
  0x28   : > { %p598_p6 = pnand %p596_p3, %p582_p5  ;;  %p604_p4 = scmp.lt.s32.totalorder %s602_s28, %s595_s20 }
  0x2a   : > { %p599_p11 = pneg %p598_p6  ;;  %p605_p10 = por %p604_p4, %p603_p9 }
  0x2c   : > { %p606_p12 = pnand %p605_p10, %p599_p11 }
  0x2e   : > { %609 = shalt.err (!%p606_p12)
}
  0x2f   : > { %509 = dma.hbm_to_vmem [thread:$0]  (!%p826_p0), %s820_s30, 128, %s822_s4, %s134_s6  }
  0x30   : > { %p998_p1 = scmp.lt.s32.totalorder %s726_s14, 3  ;;  %p999_p2 = scmp.ge.s32.totalorder %s726_s14, 1 }
  0x31   : > { %s485_s3 = sshll.u32 %s813_s25, 1  ;;  %s499_s7 = sshll.u32 %s722_s13, 5 }
  0x32   : > { %p862_p7 = pnand %p999_p2, %p998_p1  ;;  %s871_s16 = scalar_lea.hbm %s989_s1, %s499_s7 }
  0x33   : > { %s158_s18 = scalar_lea.vmem [#allocation8], %s485_s3  ;;  %s155_s30 = scalar_lea.sflag [#allocation9], %s813_s25 }
  0x34   : > { %s1000_s29 = scalar_select %p862_p7, 1, 0 }
  0x35   : > { %s168_s19 = sshll.u32 %s158_s18, 4  ;;  %s610_s4 = scalar_lea.hbm %s871_s16, 32  ;;  %s169_s19 = int_to_ptr.vmem [resolvable:$true] %s168_s19 }
  0x36   : > { %p611_p9 = scmp.ne.s32.totalorder %s871_s16, %s610_s4  ;;  %s615_s26 = scalar_lea.hbm %s989_s1, 64 }
  0x37   : > { %p616_p3 = scmp.lt.u32.totalorder %s871_s16, %s989_s1  ;;  %p617_p6 = scmp.lt.u32.totalorder %s615_s26, %s610_s4 }
  0x38   : > { %p613_p11 = pnand %p611_p9, %p582_p5  ;;  %p619_p10 = scmp.lt.u32.totalorder %s610_s4, %s871_s16 }
  0x39   : > { %p618_p4 = por %p617_p6, %p616_p3 }
  0x3a   : > { %p614_p13 = pneg %p613_p11 }
  0x3b   : > { %p620_p12 = por %p619_p10, %p618_p4 }
  0x3d   : > { %p621_p1 = pnand %p620_p12, %p614_p13 }
  0x3f   : > { %624 = shalt.err (!%p621_p1)
}
  0x40   : > { %s625_s25 = scalar_lea.vmem %s169_s19, 32  ;;  %s729_s3 = smov [#allocation8]  }
  0x41   : > { %p626_p2 = scmp.ne.s32.totalorder %s169_s19, %s625_s25  ;;  %s630_s7 = sshll.u32 %s729_s3, 4  ;;  %s631_s7 = int_to_ptr.vmem [resolvable:$false] %s630_s7 }
  0x42   : > { %s632_s8 = scalar_lea.vmem %s631_s7, 64  ;;  %p633_p8 = scmp.lt.s32.totalorder %s169_s19, %s631_s7 }
  0x43   : > { %p628_p9 = pnand %p626_p2, %p582_p5  ;;  %p634_p7 = scmp.lt.s32.totalorder %s632_s8, %s625_s25 }
  0x45   : > { %p629_p11 = pneg %p628_p9  ;;  %p635_p3 = por %p634_p7, %p633_p8 }
  0x47   : > { %p636_p6 = pnand %p635_p3, %p629_p11 }
  0x49   : > { %639 = shalt.err (!%p636_p6)
}
  0x4a   : > { %512 = dma.hbm_to_vmem [thread:$0]  (!%p826_p0), %s871_s16, 32, %s169_s19, %s155_s30  }
  0x4b   : > { %p1001_p13 = scmp.ne.s32.totalorder %s1000_s29, 0 }
  0x4c   : > { %s896_s15 = sand.u32 (!%p1001_p13), 1, %s710_s10   ;;  %p1002_p5 = scmp.ne.s32.totalorder (!%p1001_p13), %s994_s21, 0 }
  0x4d   : > { %177 = sbr.rel (%p1001_p13) target bundleno = 474 (0x1da), region = 28  ;;  %s489_s18 = sshll.u32 (!%p1001_p13), %s896_s15, 3 }
  0x4e   : > { %s180_s4 = scalar_lea.sflag (!%p1001_p13), [#allocation6], %s896_s15  ;;  %s183_s6 = scalar_lea.vmem (!%p1001_p13), [#allocation5], %s489_s18 }
  0x54   : > { %693 = dma.done.wait (%p1002_p5), %s180_s4, 128  }
  0x55   : > { %695 = vsyncadd (%p1002_p5), %s180_s4, 4294967168  ;;  %s490_s5 = sshll.u32 %s896_s15, 1  ;;  %s189_s29 = scalar_lea.sflag [#allocation9], %s896_s15 }
  0x56   : > { %s906_s16 = scalar_lea.vmem [#allocation8], %s490_s5 }
  0x57   : > { %697 = dma.done.wait (%p1002_p5), %s189_s29, 32  }
  0x58   : > { %699 = vsyncadd (%p1002_p5), %s189_s29, 4294967264  ;;  %vm224_vm0 = vcmask 3072   ;;  %v730_v0 = vmov 0   ;;  %v731_v1 = vmov 0.0   ;;  %vm233_vm1 = vcmask 1043456   ;;  %v228_v2 = vld [vmem:[%s183_s6] sm:$0xff] }
  0x59   : > { %569 = vset.pattern.permute.xlu1 %v730_v0  ;;  %570 = vset.pattern.permute.xlu0 %v730_v0  ;;  %226 = vst.msk [vmem:[#allocation3] sm:$0xf] %vm224_vm0, %v731_v1  ;;  %225 = vst.msk [vmem:[#allocation2] sm:$0xf] %vm224_vm0, %v731_v1  ;;  %v231_v3 = vcombine.high %v228_v2, %v228_v2  ;;  %v234_v4 = vsel %vm233_vm1, %v228_v2, -inf  ;;  %v281_v36 = vlaneseq  ;;  %s491_s21 = sshll.u32 %s896_s15, 2 }
  0x5a   : > { %227 = vst.msk [vmem:[#allocation4] sm:$0xf] %vm224_vm0, %v731_v1  ;;  %v235_v5 = vrot.slane %v234_v4, 4  ;;  %v229_v38 = vld [vmem:[%s906_s16] sm:$0x3]  ;;  %s217_s19 = scalar_lea.vmem [#allocation10], %s491_s21 }
  0x5b   : > { %v241_v6 = vsel %vm233_vm1, %v231_v3, -inf  ;;  %v282_v39 = vshrl.u32 %v281_v36, 7  ;;  %vm279_vm2 = vcmp.ge.s32.totalorder %v229_v38, 0  ;;  %s371_s30 = sshll.u32 %s217_s19, 4  ;;  %s495_s20 = sshll.u32 %s718_s12, 6  ;;  %s936_s30 = int_to_ptr.vmem [resolvable:$true] %s371_s30 }
  0x5c   : > { %v236_v7 = vmax.f32 %v234_v4, %v235_v5  ;;  %v242_v8 = vrot.slane %v241_v6, 4  ;;  %v280_v41 = vsel %vm279_vm2, 1, %v730_v0  ;;  %s941_s28 = scalar_lea.hbm %s990_s2, %s495_s20  ;;  %s358_s25 = scalar_lea.sflag [#allocation7], %s896_s15 }
  0x5d   : > { %v283_v40 = vsub.s32 0, %v282_v39  ;;  %v287_v42 = vsub.s32 1, %v282_v39  ;;  %s640_s3 = scalar_lea.vmem %s936_s30, 64  ;;  %p1003_p0 = scmp.ne.s32.totalorder %s995_s22, 0 }
  0x5e   : > { %v237_v9 = vrot.slane %v236_v7, 2  ;;  %v243_v10 = vmax.f32 %v241_v6, %v242_v8  ;;  %p641_p8 = scmp.ne.s32.totalorder %s936_s30, %s640_s3  ;;  %s732_s7 = smov [#allocation10]  }
  0x5f   : > { %v284_v44 = vrot.slane %v280_v41, %v283_v40  ;;  %v301_v45 = vrot.slane %v229_v38, %v283_v40  ;;  %v305_v46 = vrot.slane %v229_v38, %v287_v42  ;;  %v288_v48 = vrot.slane %v280_v41, %v287_v42  ;;  %s644_s12 = sshll.u32 %s732_s7, 4  ;;  %s645_s12 = int_to_ptr.vmem [resolvable:$false] %s644_s12 }
  0x60   : > { %v238_v11 = vmax.f32 %v236_v7, %v237_v9  ;;  %v244_v12 = vrot.slane %v243_v10, 2  ;;  %v308_v4 = vld [vmem:[#allocation2] sm:$0xf]  ;;  %p642_p7 = pnand %p641_p8, %p1003_p0  ;;  %s646_s8 = scalar_lea.vmem %s645_s12, 128 }
  0x61   : > { %vm289_vm3 = vcmp.eq.s32.totalorder %v284_v44, 1  ;;  %vm306_vm4 = vcmp.eq.s32.totalorder %v282_v39, %v301_v45  ;;  %vm307_vm5 = vcmp.eq.s32.totalorder %v282_v39, %v305_v46  ;;  %vm290_vm6 = vcmp.eq.s32.totalorder %v288_v48, 1  ;;  %v327_v8 = vld [vmem:[#allocation4] sm:$0xf]  ;;  %p647_p10 = scmp.lt.s32.totalorder %s936_s30, %s645_s12  ;;  %p648_p12 = scmp.lt.s32.totalorder %s646_s8, %s640_s3 }
  0x62   : > { %v239_v13 = vrot.slane %v238_v11, 1  ;;  %v245_v14 = vmax.f32 %v243_v10, %v244_v12  ;;  %v492_v53 = vsel %vm306_vm4, 1.0, %v731_v1  ;;  %v493_v54 = vsel %vm307_vm5, 1.0, %v731_v1  ;;  %v319_v1 = vld [vmem:[#allocation3] sm:$0xf]  ;;  %p643_p4 = pneg %p642_p7 }
  0x63   : > { %v332_v60 = vsel %vm233_vm1, %v492_v53, 0.0  ;;  %v333_v61 = vsel %vm233_vm1, %v493_v54, 0.0  ;;  %p649_p1 = por %p648_p12, %p647_p10 }
  0x64   : > { %v240_v15 = vmax.f32 %v238_v11, %v239_v13  ;;  %v246_v16 = vrot.slane %v245_v14, 1  ;;  %v334_v3 = vadd.f32 %v333_v61, %v332_v60 }
  0x65   : > { %p650_p2 = pnand %p649_p1, %p643_p4 }
  0x66   : > { %v247_v17 = vmax.f32 %v245_v14, %v246_v16 }
  0x68   : > { %v250_v18 = vcombine.low %v240_v15, %v247_v17 }
  0x6a   : > { %v252_v19 = vsub.f32 %v228_v2, %v250_v18 }
  0x6c   : > { %v253_v20 = vmul.f32 1.442695, %v252_v19 }
  0x6e   : > { %572 = vpow2.f32 %v253_v20 }
  0x78   : > { %v573_v21 = vpop.eup %572 }
  0x79   : > { %v256_v22 = vcombine.high %v573_v21, %v573_v21  ;;  %v258_v23 = vsel %vm233_vm1, %v573_v21, 0.0 }
  0x7a   : > { %v259_v24 = vrot.slane %v258_v23, 4 }
  0x7b   : > { %v265_v25 = vsel %vm233_vm1, %v256_v22, 0.0 }
  0x7c   : > { %v260_v26 = vadd.f32 %v259_v24, %v258_v23  ;;  %v266_v27 = vrot.slane %v265_v25, 4 }
  0x7e   : > { %v261_v28 = vrot.slane %v260_v26, 2  ;;  %v267_v29 = vadd.f32 %v266_v27, %v265_v25 }
  0x80   : > { %v262_v30 = vadd.f32 %v261_v28, %v260_v26  ;;  %v268_v31 = vrot.slane %v267_v29, 2 }
  0x82   : > { %v263_v32 = vrot.slane %v262_v30, 1  ;;  %v269_v33 = vadd.f32 %v268_v31, %v267_v29 }
  0x84   : > { %v264_v34 = vadd.f32 %v263_v32, %v262_v30  ;;  %v270_v35 = vrot.slane %v269_v33, 1 }
  0x86   : > { %v271_v37 = vadd.f32 %v270_v35, %v269_v33  ;;  %574 = vrcp.f32 %v264_v34 }
  0x88   : > { %576 = vrcp.f32 %v271_v37 }
  0x90   : > { %v575_v43 = vpop.eup %574 }
  0x92   : > { %v577_v47 = vpop.eup %576 }
  0x93   : > { %v276_v49 = vcombine.low %v575_v43, %v577_v47 }
  0x95   : > { %v278_v50 = vmul.f32 %v573_v21, %v276_v49 }
  0x97   : > { %v292_v51 = vcombine.high %v278_v50, %v278_v50  ;;  %v294_v52 = vsel %vm289_vm3, %v278_v50, 0.0 }
  0x98   : > { %v320_v55 = vsel %vm233_vm1, %v294_v52, 0.0  ;;  %v309_v56 = vsel %vm306_vm4, %v294_v52, 0.0 }
  0x99   : > { %v295_v57 = vsel %vm290_vm6, %v292_v51, 0.0  ;;  %v311_v58 = vsel %vm233_vm1, %v309_v56, 0.0 }
  0x9a   : > { %v321_v59 = vsel %vm233_vm1, %v295_v57, 0.0  ;;  %v310_v62 = vsel %vm307_vm5, %v295_v57, 0.0 }
  0x9b   : > { %v322_v63 = vadd.f32 %v321_v59, %v320_v55  ;;  %v312_v0 = vsel %vm233_vm1, %v310_v62, 0.0 }
  0x9c   : > { %v313_v2 = vadd.f32 %v312_v0, %v311_v58 }
  0x9d   : > { %323 = vadd.xlane.f32.xlu0 %v322_v63 }
  0x9e   : > { %314 = vadd.xlane.f32.xlu1 %v313_v2 }
  0xa1   : > { %335 = vadd.xlane.f32.xlu0 %v334_v3 }
 0x12a   : > { %v324_v5 = vpop.xlane.xlu0 %323 }
 0x12b   : > { %v325_v6 = vadd.f32 %v324_v5, %v319_v1  ;;  %v315_v7 = vpop.xlane.xlu1 %314 }
 0x12c   : > { %v316_v9 = vadd.f32 %v315_v7, %v308_v4 }
 0x12d   : > { %326 = vst.msk [vmem:[#allocation3] sm:$0xf] %vm224_vm0, %v325_v6 }
 0x12e   : > { %v336_v10 = vpop.xlane.xlu0 %335  ;;  %318 = vst.msk [vmem:[#allocation2] sm:$0xf] %vm224_vm0, %v316_v9 }
 0x12f   : > { %v337_v11 = vadd.f32 %v336_v10, %v327_v8 }
 0x131   : > { %338 = vst.msk [vmem:[#allocation4] sm:$0xf] %vm224_vm0, %v337_v11 }
 0x134   : > { %v343_v13 = vld [vmem:[#allocation3] sm:$0xf] }
 0x135   : > { %v342_v12 = vld [vmem:[#allocation2] sm:$0xf] }
 0x136   : > { %v347_v18 = vadd.f32 1e-06, %v342_v12 }
 0x138   : > { %v344_v14 = vld [vmem:[#allocation4] sm:$0xf] }
 0x139   : > { %v345_v15 = vadd.f32 %v344_v14, %v343_v13 }
 0x13b   : > { %v346_v16 = vsub.f32 %v345_v15, %v342_v12 }
 0x13d   : > { %v348_v17 = vadd.f32 1e-06, %v346_v16 }
 0x13f   : > { %578 = vrcp.f32 %v348_v17 }
 0x149   : > { %v579_v19 = vpop.eup %578 }
 0x14a   : > { %v350_v20 = vmul.f32 %v579_v19, %v347_v18 }
 0x14c   : > { %353 = vperm.xlu1 %569, %v350_v20  }
 0x1cb   : > { %v354_v21 = vpop.permute.xlu1 %353 }
 0x1cc   : > { %356 = vst [vmem:[%s217_s19] sm:$0xf] %v354_v21 }
 0x1cd   : > { %653 = shalt.err (!%p650_p2)
}
 0x1ce   : > { %s654_s15 = scalar_lea.hbm %s941_s28, 64  ;;  %s658_s6 = scalar_lea.hbm %s990_s2, 128 }
 0x1cf   : > { %p655_p9 = scmp.ne.s32.totalorder %s941_s28, %s654_s15  ;;  %p659_p6 = scmp.lt.u32.totalorder %s941_s28, %s990_s2 }
 0x1d0   : > { %p660_p13 = scmp.lt.u32.totalorder %s658_s6, %s654_s15  ;;  %p662_p8 = scmp.lt.u32.totalorder %s654_s15, %s941_s28 }
 0x1d1   : > { %p656_p11 = pnand %p655_p9, %p1003_p0 }
 0x1d2   : > { %p661_p5 = por %p660_p13, %p659_p6 }
 0x1d3   : > { %p657_p3 = pneg %p656_p11 }
 0x1d4   : > { %p663_p7 = por %p662_p8, %p661_p5 }
 0x1d6   : > { %p664_p4 = pnand %p663_p7, %p657_p3 }
 0x1d8   : > { %667 = shalt.err (!%p664_p4)
}
 0x1d9   : > { %504 = dma.vmem_to_hbm [thread:$0]  (%p1003_p0), %s936_s30, 64, %s941_s28, %s358_s25  }
 0x1da PF: > { %s383_s16 = sand.u32 1, %s706_s9   ;;  %p1004_p10 = scmp.ne.s32.totalorder %s996_s24, 0 }
 0x1db   : > { %p1005_p12 = scmp.ge.s32.totalorder %s726_s14, 2  ;;  %s384_s21 = scalar_lea.sflag [#allocation7], %s383_s16 }
 0x1dd   : > { %p514_p1 = pnand %p1005_p12, %p1004_p10 }
 0x1df   : > { %701 = dma.done.wait (!%p514_p1), %s384_s21, 64  }
 0x1e0   : > { %703 = vsyncadd (!%p514_p1), %s384_s21, 4294967232  ;;  %s21_s14 = sadd.s32 1, %s726_s14   ;;  %s1006_s9 = smov %s710_s10 }
 0x1e1   : > { %p18_p2 = scmp.ge.s32.totalorder %s21_s14, 4   ;;  %s1007_s10 = smov %s714_s11 }
 0x1e2   : > { %s1008_s11 = smov %s804_s23  ;;  %s1009_s12 = smov %s722_s13 }
 0x1e3   : > { %s1010_s13 = smov %s1012_s17  ;;  %20 = sbr.rel (!%p18_p2) target bundleno = 8 (0x8), region = 94 }
 0x1ea   :  { %389 = vsyncpa [#allocation6], 1 }
 0x1eb   :  { %391 = vsyncpa [#allocation6 + $0x1], 1 }
 0x1ec   :  { %392 = vsyncpa [#allocation9], 1 }
 0x1ed   :  { %394 = vsyncpa [#allocation9 + $0x1], 1 }
 0x1ee   :  { %395 = vsyncpa [#allocation7], 1 }
 0x1ef   :  { %397 = vsyncpa [#allocation7 + $0x1], 1 }

</bundles_post_ra>
